<compile_context>
chip_gen: v7x
topology: tpu7x:2x2x1
jax: 0.10.0
libtpu: 0.0.40
codegen_flags: <defaults>
</compile_context>

<pallas_src>
import functools

import jax
import jax.numpy as jnp
from jax.experimental import pallas as pl
from jax.experimental.pallas import tpu as pltpu


def _ce_label_smooth_kernel(
    labels_ref, logits_ref, out_ref, *, epsilon, total_batch, tile_batch
):
    # labels_ref: (B_padded, 1) int32, resident in VMEM for the whole grid
    # logits_ref: (TB, C) native dtype, streamed per tile
    # out_ref:    (TB, 1) f32 per-row loss for this tile (masked past B)
    i = pl.program_id(0)

    x = logits_ref[...].astype(jnp.float32)            # cast per tile, f32 math
    tb, c = x.shape

    start = i * tile_batch
    if tile_batch % 8 == 0:
        start = pl.multiple_of(start, 8)
    labels = labels_ref[pl.ds(start, tile_batch), :]    # (TB, 1)

    # Row reduction 1 + 2: numerically-stable logsumexp.
    m = jnp.max(x, axis=1, keepdims=True)                               # (TB, 1)
    lse = m + jnp.log(jnp.sum(jnp.exp(x - m), axis=1, keepdims=True))   # (TB, 1)

    # Row reduction 3: sum_c t_c * x_bc with t folded into a two-value select.
    class_ids = jax.lax.broadcasted_iota(jnp.int32, (tb, c), 1)
    eps_over_c = jnp.float32(epsilon / float(c))
    on_weight = jnp.float32(1.0 - epsilon + epsilon / float(c))
    w = jnp.where(class_ids == labels, on_weight, eps_over_c)           # (TB, C)
    tx = jnp.sum(w * x, axis=1, keepdims=True)                          # (TB, 1)

    per_row = lse - tx                                                  # (TB, 1)

    # Zero rows beyond the true batch size (padded final tile).  Garbage in
    # padded rows (possibly NaN/Inf) never leaves those rows and is dropped
    # here, so the wrapper may sum the whole padded output.
    row_ids = i * tile_batch + jax.lax.broadcasted_iota(jnp.int32, (tb, 1), 0)
    out_ref[...] = jnp.where(row_ids < total_batch, per_row, jnp.float32(0.0))


def _vmem_plan():
    """(native-dtype bytes per logits tile, vmem_limit_bytes), generation-aware."""
    try:
        vmem_cap = int(pltpu.get_tpu_info().vmem_capacity_bytes)
    except Exception:
        vmem_cap = 64 * 1024 * 1024          # conservative fallback (v7x-sized)
    if vmem_cap <= 64 * 1024 * 1024:
        # v7x: 64 MiB/TC.  2x native (double buffer) + ~3x f32 temporaries.
        return 4 * 1024 * 1024, 48 * 1024 * 1024
    # v5e / v6e: 128 MiB.
    return 8 * 1024 * 1024, 96 * 1024 * 1024


def _choose_tile_batch(b, c, itemsize, native_tile_budget):
    """Largest multiple-of-8 batch tile keeping the native logits tile in budget."""
    tb = native_tile_budget // (max(c, 1) * max(itemsize, 1))
    tb = max(8, min(int(tb), 4096))
    tb = max(8, (tb // 8) * 8)
    if b <= tb:
        return b  # single tile; block == full array dim is always legal
    return tb


def cross_entropy_label_smooth(logits, labels, *, num_classes, epsilon=0.1,
                               tile_batch=None):
    """JAX/Pallas equivalent of CrossEntropyLabelSmooth.forward."""
    b, c = logits.shape
    assert c == num_classes, "class dim must equal num_classes"
    itemsize = jnp.dtype(logits.dtype).itemsize

    native_budget, vmem_limit = _vmem_plan()
    if tile_batch is None:
        tile_batch = _choose_tile_batch(b, c, itemsize, native_budget)
    else:
        tile_batch = min(int(tile_batch), b)
        if tile_batch != b:  # keep the (8, 128) sublane rule satisfied
            tile_batch = max(8, (tile_batch // 8) * 8)

    num_tiles = pl.cdiv(b, tile_batch)
    b_padded = num_tiles * tile_batch

    labels2d = labels.reshape(b, 1).astype(jnp.int32)
    if b_padded != b:
        labels2d = jnp.pad(labels2d, ((0, b_padded - b), (0, 0)))

    kernel = functools.partial(
        _ce_label_smooth_kernel,
        epsilon=float(epsilon),
        total_batch=b,
        tile_batch=tile_batch,
    )

    cost = pl.CostEstimate(
        flops=5 * b * c,
        transcendentals=b * c + b,
        bytes_accessed=b * c * itemsize + b_padded * 4 + b_padded * 4,
    )

    per_row = pl.pallas_call(
        kernel,
        out_shape=jax.ShapeDtypeStruct((b_padded, 1), jnp.float32),
        grid=(num_tiles,),
        in_specs=[
            pl.BlockSpec((b_padded, 1), lambda i: (0, 0)),    # labels: resident
            pl.BlockSpec((tile_batch, c), lambda i: (i, 0)),  # logits: streamed
        ],
        out_specs=pl.BlockSpec((tile_batch, 1), lambda i: (i, 0)),
        compiler_params=pltpu.CompilerParams(
            dimension_semantics=("parallel",),  # independent tiles -> both TCs on v7x
            vmem_limit_bytes=vmem_limit,
        ),
        cost_estimate=cost,
    )(labels2d, logits)  # logits stay in native dtype; cast happens in-kernel

    return jnp.sum(per_row) / jnp.float32(b)


def _reference(logits, labels, *, num_classes, epsilon=0.1):
    x = logits.astype(jnp.float32)
    log_probs = jax.nn.log_softmax(x, axis=1)
    t = jax.nn.one_hot(labels, num_classes, dtype=jnp.float32)
    t = (1.0 - epsilon) * t + epsilon / num_classes
    return (-t * log_probs).mean(0).sum()


if __name__ == "__main__":
    batch = 20          # not a multiple of the tile -> exercises padding/masking
    num_classes = 32
    epsilon = 0.1

    key = jax.random.PRNGKey(0)
    k_logits, k_labels = jax.random.split(key)
    logits = jax.random.normal(
        k_logits, (batch, num_classes), dtype=jnp.float32
    ).astype(jnp.bfloat16)  # native bf16 ingest; kernel casts to f32 per tile
    labels = jax.random.randint(k_labels, (batch,), 0, num_classes, dtype=jnp.int32)

    loss = cross_entropy_label_smooth(
        logits, labels, num_classes=num_classes, epsilon=epsilon, tile_batch=8
    )
    loss = jax.block_until_ready(loss)

    ref = _reference(logits, labels, num_classes=num_classes, epsilon=epsilon)
    assert jnp.allclose(loss, ref, atol=1e-4, rtol=1e-4), (loss, ref)

    print("KERNEL_OK")
</pallas_src>

<mosaic_0001>
module attributes {stable_mosaic.version = 11 : i64} {
  func.func @_ce_label_smooth_kernel(%arg0: i32, %arg1: memref<24x1xi32, #tpu.memory_space<vmem>>, %arg2: memref<8x32xbf16, #tpu.memory_space<vmem>>, %arg3: memref<8x1xf32, #tpu.memory_space<vmem>>) attributes {dimension_semantics = [#tpu.dimension_semantics<parallel>], iteration_bounds = array<i64: 3>, scalar_prefetch = 0 : i64, scratch_operands = 0 : i64, tpu.core_type = #tpu.core_type<tc>, window_params = [{pipeline_mode = #tpu.pipeline_mode<synchronous>, transform_indices = @transform_0, window_bounds = array<i64: 24, 1>}, {transform_indices = @transform_1, window_bounds = array<i64: 8, 32>}, {transform_indices = @transform_2, window_bounds = array<i64: 8, 1>}]} {
    %c0 = arith.constant 0 : index
    %c0_0 = arith.constant 0 : index
    %0 = vector.load %arg2[%c0, %c0_0] : memref<8x32xbf16, #tpu.memory_space<vmem>>, vector<8x32xbf16>
    %1 = arith.extf %0 : vector<8x32xbf16> to vector<8x32xf32>
    %c8_i32 = arith.constant 8 : i32
    %2 = arith.muli %arg0, %c8_i32 : i32
    %3 = tpu.assume_multiple %2, 8 : i32
    %4 = arith.index_cast %3 : i32 to index
    %c0_1 = arith.constant 0 : index
    %5 = vector.load %arg1[%4, %c0_1] : memref<24x1xi32, #tpu.memory_space<vmem>>, vector<8x1xi32>
    %cst = arith.constant dense<0xFF800000> : vector<8xf32>
    %6 = vector.multi_reduction <maximumf>, %1, %cst [1] : vector<8x32xf32> to vector<8xf32>
    %7 = vector.shape_cast %6 : vector<8xf32> to vector<8x1xf32>
    %8 = vector.broadcast %7 : vector<8x1xf32> to vector<8x32xf32>
    %9 = arith.subf %1, %8 : vector<8x32xf32>
    %10 = math.exp %9 : vector<8x32xf32>
    %cst_2 = arith.constant dense<0.000000e+00> : vector<8xf32>
    %11 = vector.multi_reduction <add>, %10, %cst_2 [1] : vector<8x32xf32> to vector<8xf32>
    %12 = vector.shape_cast %11 : vector<8xf32> to vector<8x1xf32>
    %13 = math.log %12 : vector<8x1xf32>
    %14 = arith.addf %7, %13 : vector<8x1xf32>
    %15 = tpu.iota {dimensions = array<i32: 1>} : vector<8x32xi32>
    %16 = vector.broadcast %5 : vector<8x1xi32> to vector<8x32xi32>
    %17 = arith.cmpi eq, %15, %16 : vector<8x32xi32>
    %cst_3 = arith.constant 0.903124988 : f32
    %cst_4 = arith.constant 3.125000e-03 : f32
    %18 = vector.broadcast %cst_3 : f32 to vector<8x32xf32>
    %19 = vector.broadcast %cst_4 : f32 to vector<8x32xf32>
    %20 = arith.select %17, %18, %19 : vector<8x32xi1>, vector<8x32xf32>
    %21 = arith.mulf %20, %1 : vector<8x32xf32>
    %cst_5 = arith.constant dense<0.000000e+00> : vector<8xf32>
    %22 = vector.multi_reduction <add>, %21, %cst_5 [1] : vector<8x32xf32> to vector<8xf32>
    %23 = vector.shape_cast %22 : vector<8xf32> to vector<8x1xf32>
    %24 = arith.subf %14, %23 : vector<8x1xf32>
    %c8_i32_6 = arith.constant 8 : i32
    %25 = arith.muli %arg0, %c8_i32_6 : i32
    %26 = tpu.iota {dimensions = array<i32: 0>} : vector<8x1xi32>
    %27 = vector.broadcast %25 : i32 to vector<8x1xi32>
    %28 = arith.addi %27, %26 : vector<8x1xi32>
    %c20_i32 = arith.constant 20 : i32
    %29 = vector.broadcast %c20_i32 : i32 to vector<8x1xi32>
    %30 = arith.cmpi slt, %28, %29 : vector<8x1xi32>
    %cst_7 = arith.constant 0.000000e+00 : f32
    %31 = vector.broadcast %cst_7 : f32 to vector<8x1xf32>
    %32 = arith.select %30, %24, %31 : vector<8x1xi1>, vector<8x1xf32>
    %c0_8 = arith.constant 0 : index
    %c0_9 = arith.constant 0 : index
    %33 = vector.load %arg3[%c0_8, %c0_9] : memref<8x1xf32, #tpu.memory_space<vmem>>, vector<8x1xf32>
    tpu.vector_store %arg3[%c0_8, %c0_9], %32 {strides = array<i32>} : memref<8x1xf32, #tpu.memory_space<vmem>>, vector<8x1xf32>,
    return
  }
  func.func @transform_0(%arg0: i32) -> (i32, i32) {
    %c0_i32 = arith.constant 0 : i32
    %c0_i32_0 = arith.constant 0 : i32
    %c0_i32_1 = arith.constant 0 : i32
    return %c0_i32, %c0_i32_0 : i32, i32
  }
  func.func @transform_1(%arg0: i32) -> (i32, i32) {
    %c0_i32 = arith.constant 0 : i32
    %c0_i32_0 = arith.constant 0 : i32
    return %arg0, %c0_i32 : i32, i32
  }
  func.func @transform_2(%arg0: i32) -> (i32, i32) {
    %c0_i32 = arith.constant 0 : i32
    %c0_i32_0 = arith.constant 0 : i32
    return %arg0, %c0_i32 : i32, i32
  }
}

</mosaic_0001>

<bundles_post_ra>
// kernel: tpu_custom_call.1
= control target key start
LH: loop header
LB: loop body
LE: loop exit
PB: predicated region body
PF: predicated region fallthrough
CT: control target
= control target key end

     0   :  { %s282_s9 = smov 0   ;;  %s314_s0 = inlined_call_operand.vmem [shape: s32[24,1], index: 0, kind: input, shape index: {}]   ;;  %s315_s1 = inlined_call_operand.vmem [shape: bf16[20,32], index: 1, kind: input, shape index: {}]   ;;  %s316_s2 = inlined_call_operand.vmem [shape: f32[24,1], index: 2, kind: output, shape index: {}]  }
   0x1 LB: > { %s288_s10 = sadd.s32 4294967295, %s263_s9   ;;  %p236_p0 = scmp.ge.s32.totalorder %s263_s9, 1  ;;  %s263_s9 = sphi %s282_s9, %s12_s9  }
   0x2   : > { %p111_p1 = scmp.lt.s32.totalorder %s263_s9, 4 }
   0x4   : > { %p112_p2 = pnand %p236_p0, %p111_p1 }
   0x5   : > { %p131_p3 = scmp.lt.s32.totalorder (!%p112_p2), %s288_s10, 2  ;;  %v265_v0 = vmov (!%p112_p2), 0   ;;  %vm144_vm0 = vcmask (!%p112_p2), 261120   ;;  %s239_s16 = sshll.u32 (!%p112_p2), %s288_s10, 3  ;;  %v157_v7 = vlaneseq (!%p112_p2)  ;;  %v266_v11 = vmov (!%p112_p2), 0.003125  }
   0x6   : > { %115 = sbr.rel (%p112_p2) target bundleno = 340 (0x154), region = 28  ;;  %252 = vset.pattern.permute.xlu0 (!%p112_p2), %v265_v0  ;;  %s142_s19 = scalar_lea.vmem (!%p112_p2), %s314_s0, %s239_s16  ;;  %v171_v19 = vstv (!%p112_p2), %s239_s16  ;;  %vm175_vm3 = vcmask (!%p112_p2), 7168  }
   0x7   : > { %v143_v4 = vld [vmem:[%s142_s19] sm:$0xff] (!%p112_p2)  ;;  %v158_v9 = vand.u32 (!%p112_p2), 127, %v157_v7  ;;  %v170_v18 = vshrl.u32 (!%p112_p2), %v157_v7, 7 }
   0x9   : > { %v172_v21 = vadd.s32 (!%p112_p2), %v171_v19, %v170_v18 }
   0xb   : > { %vm173_vm2 = vcmp.lt.s32.totalorder (!%p112_p2), %v172_v21, 20 }
   0xd   : > { %s294_s11 = scalar_select %p131_p3, %s288_s10, 2 }
   0xf   : > { %s237_s12 = sshll.u32 %s294_s11, 2  ;;  %s238_s20 = sshll.u32 %s294_s11, 3 }
  0x10   : > { %s134_s15 = scalar_lea.vmem %s315_s1, %s237_s12  ;;  %s138_s23 = scalar_lea.vmem %s316_s2, %s238_s20 }
  0x11   : > { %v139_v1 = vld [vmem:[%s134_s15] sm:$0xf] }
  0x12   : > { %v140_v2 = vunpack.c.l.bf16 %v139_v1 }
  0x14   : > { %v145_v3 = vsel %vm144_vm0, %v140_v2, -inf }
  0x15   : > { %146 = vmax.xlane.f32.xlu0 %v145_v3 }
  0x2b   : > { %160 = vperm.xlu0 %252, %v143_v4  }
  0xa2   : > { %v147_v5 = vpop.xlane.xlu0 %146 }
  0xa3   : > { %v148_v6 = vsub.f32 %v140_v2, %v147_v5 }
  0xa5   : > { %v149_v8 = vmul.f32 1.442695, %v148_v6 }
  0xa7   : > { %253 = vpow2.f32 %v149_v8 }
  0xaa   : > { %v161_v10 = vpop.permute.xlu0 %160 }
  0xab   : > { %vm162_vm1 = vcmp.eq.s32.totalorder %v158_v9, %v161_v10 }
  0xac   : > { %v163_v12 = vsel %vm162_vm1, 0.903125, %v266_v11 }
  0xad   : > { %v164_v13 = vmul.f32 %v163_v12, %v140_v2 }
  0xaf   : > { %v165_v16 = vsel %vm144_vm0, %v164_v13, 0.0 }
  0xb1   : > { %v254_v14 = vpop.eup %253 }
  0xb2   : > { %v151_v15 = vsel %vm144_vm0, %v254_v14, 0.0 }
  0xb3   : > { %152 = vadd.xlane.f32.xlu1 %v151_v15 }
  0xb7   : > { %166 = vadd.xlane.f32.xlu1 %v165_v16 }
 0x140   : > { %v153_v17 = vpop.xlane.xlu1 %152 }
 0x141   : > { %255 = vlog2.f32 %v153_v17 }
 0x144   : > { %v167_v23 = vpop.xlane.xlu1 %166 }
 0x14b   : > { %v256_v20 = vpop.eup %255 }
 0x14c   : > { %v155_v22 = vmul.f32 0.6931472, %v256_v20 }
 0x14e   : > { %v156_v24 = vadd.f32 %v155_v22, %v147_v5 }
 0x150   : > { %v168_v25 = vsub.f32 %v156_v24, %v167_v23 }
 0x152   : > { %v174_v26 = vsel %vm173_vm2, %v168_v25, 0.0 }
 0x153   : > { %176 = vst.msk [vmem:[%s138_s23] sm:$0xff] %vm175_vm3, %v174_v26 }
 0x154 PF: > { %s12_s9 = sadd.s32 1, %s263_s9  }
 0x155   : > { %p9_p4 = scmp.ge.s32.totalorder %s12_s9, 5  }
 0x157   :  { %11 = sbr.rel (!%p9_p4) target bundleno = 1 (0x1), region = 59 }

</bundles_post_ra>
